<compile_context>
chip_gen: v6e
topology: v6e:2x2x1
jax: 0.10.0
libtpu: 0.0.40
codegen_flags: <defaults>
</compile_context>

<pallas_src>
import functools
import math

import jax
import jax.numpy as jnp
from jax.experimental import pallas as pl
from jax.experimental.pallas import tpu as pltpu

# ------------------------------------------------------------------ sizes / tiles
F_NODE = 32      # 8x0e + 8x1o (component-major)
F_ATTR = 4       # 4x0e
F_EDGE = 8       # radial basis
F_SH = 4         # 1x0e + 1x1o
F_MID = 64       # uvu TP output
F_CONV = 40      # 16x0e + 8x1o (gate input)

TILE_E = 256     # edge rows per pipelined block in the edge kernel
CHUNK_E = 128    # edge rows per manual DMA chunk in the scatter kernel
# Tiles are small relative to VMEM on every generation (v7x 64 MiB included).


# ------------------------------------------------------------------ kernel A: nodes
def _linear_up_kernel(x_ref, w_ref, y_ref):
    # equivariant Linear as one block matmul; bf16 MXU operands, f32 accumulation
    y_ref[...] = jnp.dot(x_ref[...].astype(jnp.bfloat16), w_ref[...],
                         preferred_element_type=jnp.float32)


def linear_up(x, w_up, tile_n):
    n = x.shape[0]
    return pl.pallas_call(
        _linear_up_kernel,
        out_shape=jax.ShapeDtypeStruct((n, F_NODE), jnp.float32),
        grid_spec=pltpu.PrefetchScalarGridSpec(
            num_scalar_prefetch=0,
            grid=(n // tile_n,),
            in_specs=[pl.BlockSpec((tile_n, F_NODE), lambda i: (i, 0)),
                      pl.BlockSpec((F_NODE, F_NODE), lambda i: (0, 0))],
            out_specs=pl.BlockSpec((tile_n, F_NODE), lambda i: (i, 0))),
        compiler_params=pltpu.CompilerParams(dimension_semantics=("parallel",)),
    )(x, w_up)


# ------------------------------------------------------------------ kernel B: edges
def _edge_kernel(xsrc_ref, sh_ref, ef_ref, wr1_ref, wr2_ref, wr3_ref, wlin_ref,
                 msg_ref, *, inv_sqrt_avg):
    # radial MLP 8 -> 64 -> 64 -> 32 (SiLU); intermediates never leave vregs.
    h = jnp.dot(ef_ref[...].astype(jnp.bfloat16), wr1_ref[...],
                preferred_element_type=jnp.float32)
    h = h * jax.nn.sigmoid(h)
    h = jnp.dot(h.astype(jnp.bfloat16), wr2_ref[...],
                preferred_element_type=jnp.float32)
    h = h * jax.nn.sigmoid(h)
    tpw = jnp.dot(h.astype(jnp.bfloat16), wr3_ref[...],
                  preferred_element_type=jnp.float32)            # [T, 32]

    # per-edge 'uvu' tensor product (f32 elementwise -> VPU, v5e-safe)
    x = xsrc_ref[...]
    sh = sh_ref[...]
    xs = x[:, 0:8]
    xv0 = x[:, 8:16]
    xv1 = x[:, 16:24]
    xv2 = x[:, 24:32]
    sh0 = sh[:, 0:1]
    sh1 = sh[:, 1:2]
    sh2 = sh[:, 2:3]
    sh3 = sh[:, 3:4]
    wA = tpw[:, 0:8]
    wB = tpw[:, 8:16]
    wC = tpw[:, 16:24]
    wD = tpw[:, 24:32]
    inv_sqrt3 = 0.5773502691896258                               # w3j(1,1,0) factor
    tp = jnp.concatenate([
        wA * xs * sh0,                                           # 0e x 0e -> 0e
        wB * (xv0 * sh1 + xv1 * sh2 + xv2 * sh3) * inv_sqrt3,    # 1o x 1o -> 0e
        wC * xs * sh1, wC * xs * sh2, wC * xs * sh3,             # 0e x 1o -> 1o
        wD * xv0 * sh0, wD * xv1 * sh0, wD * xv2 * sh0,          # 1o x 0e -> 1o
    ], axis=1)                                                   # [T, 64]

    # Conv Linear folded into the edge kernel: shrinks the scatter payload 64 -> 40
    # and removes a whole [E,64] HBM round trip.  1/sqrt(avg_num_neighbours) folded.
    msg_ref[...] = jnp.dot(tp.astype(jnp.bfloat16), wlin_ref[...],
                           preferred_element_type=jnp.float32) * inv_sqrt_avg


def edge_messages(x_src, sh, ef, params, avg_num_neighbours):
    e_pad = x_src.shape[0]
    kernel = functools.partial(
        _edge_kernel, inv_sqrt_avg=1.0 / math.sqrt(float(avg_num_neighbours)))
    return pl.pallas_call(
        kernel,
        out_shape=jax.ShapeDtypeStruct((e_pad, F_CONV), jnp.float32),
        grid_spec=pltpu.PrefetchScalarGridSpec(
            num_scalar_prefetch=0,
            grid=(e_pad // TILE_E,),
            in_specs=[pl.BlockSpec((TILE_E, F_NODE), lambda i: (i, 0)),
                      pl.BlockSpec((TILE_E, F_SH), lambda i: (i, 0)),
                      pl.BlockSpec((TILE_E, F_EDGE), lambda i: (i, 0)),
                      pl.BlockSpec((F_EDGE, 64), lambda i: (0, 0)),
                      pl.BlockSpec((64, 64), lambda i: (0, 0)),
                      pl.BlockSpec((64, 32), lambda i: (0, 0)),
                      pl.BlockSpec((F_MID, F_CONV), lambda i: (0, 0))],
            out_specs=pl.BlockSpec((TILE_E, F_CONV), lambda i: (i, 0))),
        compiler_params=pltpu.CompilerParams(dimension_semantics=("parallel",)),
    )(x_src, sh, ef, params["W_r1"], params["W_r2"], params["W_r3"], params["W_lin"])


# ------------------------------------------------------------- kernel C: scatter+gate
def _scatter_gate_kernel(estart_ref,                 # SMEM: [ntiles+1] edge offsets
                         msg_hbm, recv_hbm,          # HBM (pl.ANY): [E_pad,40], [1,E_pad]
                         x_ref, a_ref, wsk_ref,      # VMEM tiles / resident weight
                         out_ref,
                         msg_buf, recv_buf, sem, acc_ref,
                         *, tile_n, chunk_e, self_connection, resnet):
    i = pl.program_id(0)
    base = i * tile_n
    e_lo = estart_ref[i]
    e_hi = estart_ref[i + 1]
    nchunks = (e_hi - e_lo + (chunk_e - 1)) // chunk_e       # dynamic trip count

    acc_ref[...] = jnp.zeros_like(acc_ref)

    def fetch(c, slot):
        start = e_lo + c * chunk_e
        pltpu.make_async_copy(msg_hbm.at[pl.ds(start, chunk_e), :],
                              msg_buf.at[slot], sem.at[0, slot]).start()
        pltpu.make_async_copy(recv_hbm.at[:, pl.ds(start, chunk_e)],
                              recv_buf.at[slot], sem.at[1, slot]).start()

    @pl.when(nchunks > 0)
    def _():
        fetch(0, 0)

    # hoisted out of the loop (JAX does not CSE broadcasts)
    iota_n = jax.lax.broadcasted_iota(jnp.int32, (tile_n, chunk_e), 0)

    def body(c, carry):
        slot = c % 2
        # wait descriptors only need matching shapes/semaphores
        pltpu.make_async_copy(msg_hbm.at[pl.ds(0, chunk_e), :],
                              msg_buf.at[slot], sem.at[0, slot]).wait()
        pltpu.make_async_copy(recv_hbm.at[:, pl.ds(0, chunk_e)],
                              recv_buf.at[slot], sem.at[1, slot]).wait()

        @pl.when(c + 1 < nchunks)
        def _():
            fetch(c + 1, 1 - slot)

        # Edges are sorted by receiver; edges of other node tiles that leak into a
        # chunk fall outside [0, tile_n) after subtracting `base` and are masked
        # automatically by the comparison below.
        local = recv_buf[slot] - base                        # [1, chunk_e]
        sel = (iota_n == local).astype(jnp.float32)          # [tile_n, chunk_e]
        acc_ref[...] += jnp.dot(sel, msg_buf[slot],
                                preferred_element_type=jnp.float32)
        return carry

    jax.lax.fori_loop(0, nchunks, body, 0)

    y = acc_ref[...]
    x = x_ref[...]

    if self_connection:
        # self-connection skip TP: outer(node_feats, node_attrs) -> Linear.
        # Built in-kernel (never materialised in HBM); contraction dim 128 -> full
        # MXU K fill.  Removes the [N,40] HBM round trip the previous version had.
        a = a_ref[...]
        xa = jnp.concatenate([x * a[:, t:t + 1] for t in range(F_ATTR)], axis=1)
        sc = jnp.dot(xa.astype(jnp.bfloat16), wsk_ref[...],
                     preferred_element_type=jnp.float32)
        y = y + sc

    # Gate nonlinearity. Both scalars and gates are 0e (p=+1) -> SiLU, matching the
    # reference (`torch.tanh if ir.p == -1 else SiLU`).
    s = y[:, 0:8]
    g = y[:, 8:16]
    s_act = s * jax.nn.sigmoid(s)
    g_act = g * jax.nn.sigmoid(g)
    out = jnp.concatenate([s_act,
                           g_act * y[:, 16:24],
                           g_act * y[:, 24:32],
                           g_act * y[:, 32:40]], axis=1)
    if resnet:
        out = out + x
    out_ref[...] = out


def scatter_gate(estart, msgs, recv_row, x, attrs, w_skip, *, tile_n,
                 self_connection, resnet):
    n = x.shape[0]
    kernel = functools.partial(_scatter_gate_kernel, tile_n=tile_n,
                               chunk_e=CHUNK_E, self_connection=self_connection,
                               resnet=resnet)
    return pl.pallas_call(
        kernel,
        out_shape=jax.ShapeDtypeStruct((n, F_NODE), jnp.float32),
        grid_spec=pltpu.PrefetchScalarGridSpec(
            num_scalar_prefetch=1,                         # estart -> SMEM
            grid=(n // tile_n,),
            in_specs=[pl.BlockSpec(memory_space=pl.ANY),   # msgs stay in HBM
                      pl.BlockSpec(memory_space=pl.ANY),   # sorted receivers in HBM
                      pl.BlockSpec((tile_n, F_NODE), lambda i, es: (i, 0)),
                      pl.BlockSpec((tile_n, F_ATTR), lambda i, es: (i, 0)),
                      pl.BlockSpec((F_NODE * F_ATTR, F_CONV), lambda i, es: (0, 0))],
            out_specs=pl.BlockSpec((tile_n, F_NODE), lambda i, es: (i, 0)),
            scratch_shapes=[pltpu.VMEM((2, CHUNK_E, F_CONV), jnp.float32),
                            pltpu.VMEM((2, 1, CHUNK_E), jnp.int32),
                            pltpu.SemaphoreType.DMA((2, 2)),
                            pltpu.VMEM((tile_n, F_CONV), jnp.float32)]),
        compiler_params=pltpu.CompilerParams(dimension_semantics=("parallel",)),
    )(estart, msgs, recv_row, x, attrs, w_skip)


# ------------------------------------------------------------------ parameters
def init_params(key):
    ks = jax.random.split(key, 9)

    def rnd(k, shape, fan_in):
        return jax.random.normal(k, shape, jnp.float32) / jnp.sqrt(jnp.float32(fan_in))

    i3 = jnp.eye(3, dtype=jnp.float32)

    # linear_up: (8x0e + 8x1o) -> (8x0e + 8x1o), component-major in/out.
    w_up_s = rnd(ks[0], (8, 8), 8)
    w_up_v = rnd(ks[1], (8, 8), 8)
    w_up = jax.scipy.linalg.block_diag(w_up_s, jnp.kron(i3, w_up_v))          # [32, 32]

    # skip_tp: FullyConnectedTensorProduct((8x0e+8x1o) x 4x0e -> 16x0e + 8x1o).
    # Row order matches the in-kernel concat([x*a0 | x*a1 | x*a2 | x*a3]).
    w_sk0 = rnd(ks[2], (32, 16), 32)   # (attr t, scalar u) -> 16x0e
    w_sk1 = rnd(ks[3], (32, 8), 32)    # (attr t, vector u) -> 8x1o (shared across m)
    w_skip = jnp.zeros((128, 40), jnp.float32)
    for t in range(4):
        w_skip = w_skip.at[t * 32:t * 32 + 8, 0:16].set(w_sk0[t * 8:(t + 1) * 8])
        for m in range(3):
            w_skip = w_skip.at[t * 32 + 8 + m * 8:t * 32 + 16 + m * 8,
                               16 + m * 8:24 + m * 8].set(w_sk1[t * 8:(t + 1) * 8])

    # conv Linear: irreps_mid (16x0e + 16x1o, dim 64) -> 16x0e + 8x1o (dim 40)
    w_l_s = rnd(ks[4], (16, 16), 16)
    w_l_v = rnd(ks[5], (16, 8), 16)
    w_l_vec = jnp.concatenate([jnp.kron(i3, w_l_v[0:8]),
                               jnp.kron(i3, w_l_v[8:16])], axis=0)            # [48, 24]
    w_lin = jax.scipy.linalg.block_diag(w_l_s, w_l_vec)                        # [64, 40]

    # radial MLP (edge_feats -> per-edge TP weights): 8 -> 64 -> 64 -> 32, SiLU.
    # TODO(synk): hidden sizes of the radial FullyConnectedNet are config-dependent.
    w_r1 = rnd(ks[6], (8, 64), 8)
    w_r2 = rnd(ks[7], (64, 64), 64)
    w_r3 = rnd(ks[8], (64, 32), 64)

    bf = lambda a: a.astype(jnp.bfloat16)   # MXU operands in bf16 (f32 accumulation)
    return dict(W_up=bf(w_up), W_skip=bf(w_skip), W_lin=bf(w_lin),
                W_r1=bf(w_r1), W_r2=bf(w_r2), W_r3=bf(w_r3))


# ------------------------------------------------------------------ forward pass
def convnet_layer_forward(params, data, *, avg_num_neighbours=3.0,
                          self_connection=True, resnet=False):
    x = data["node_feats"]                       # [N, 32]
    attrs = data["node_attrs"]                   # [N, 4]
    edge_feats = data["edge_feats"]              # [E, 8]
    edge_attrs = data["edge_attrs"]              # [E, 4]
    senders = data["edge_index"][0].astype(jnp.int32)
    receivers = data["edge_index"][1].astype(jnp.int32)
    n = x.shape[0]
    e = edge_feats.shape[0]

    if n % 32 == 0:
        tile_n = 32
    elif n % 16 == 0:
        tile_n = 16
    else:
        tile_n = 8
    assert n % tile_n == 0, "node count must be a multiple of 8"

    # ---- kernel A: linear_up ----------------------------------------------------
    x_up = linear_up(x, params["W_up"], tile_n)

    # ---- sort edges by receiver so the scatter becomes per-tile segment sums ----
    order = jnp.argsort(receivers)
    recv_s = receivers[order]
    send_s = senders[order]
    ef_s = edge_feats[order]
    sh_s = edge_attrs[order]

    # Pad edges: multiple of TILE_E for the edge-kernel grid, with at least CHUNK_E
    # of slack so the scatter kernel's fixed-size chunk DMAs never run off the
    # arrays.  Pad receivers with `n` (out of range for every node tile => masked).
    e_pad = ((e + CHUNK_E + TILE_E - 1) // TILE_E) * TILE_E
    pad = e_pad - e
    recv_p = jnp.concatenate([recv_s, jnp.full((pad,), n, jnp.int32)])
    send_p = jnp.concatenate([send_s, jnp.zeros((pad,), jnp.int32)])
    ef_p = jnp.concatenate([ef_s, jnp.zeros((pad, ef_s.shape[1]), ef_s.dtype)])
    sh_p = jnp.concatenate([sh_s, jnp.zeros((pad, sh_s.shape[1]), sh_s.dtype)])

    # gather sender features
    # TODO(synk): this XLA gather could be hidden behind the edge kernel with a
    # manual per-row DMA gather; kept as glue for simplicity.
    x_src = jnp.take(x_up, send_p, axis=0)                        # [E_pad, 32]

    # ---- kernel B: radial MLP + uvu TP + conv Linear (per edge tile) ------------
    msgs = edge_messages(x_src, sh_p, ef_p, params, avg_num_neighbours)   # [E_pad, 40]

    # per-node-tile edge segment offsets (scalar prefetch for the scatter kernel)
    bounds = jnp.arange(n // tile_n + 1, dtype=jnp.int32) * tile_n
    estart = jnp.searchsorted(recv_p, bounds).astype(jnp.int32)

    # ---- kernel C: O(E) scatter + self-connection + Gate (+ optional resnet) ----
    out = scatter_gate(estart, msgs, recv_p[None, :], x, attrs, params["W_skip"],
                       tile_n=tile_n, self_connection=self_connection,
                       resnet=resnet)

    new_data = dict(data)
    new_data["node_feats"] = out
    return new_data


# ------------------------------------------------------------------ main
if __name__ == "__main__":
    key = jax.random.PRNGKey(0)
    k_in, k_par = jax.random.split(key)
    N, E = 64, 500
    ks = jax.random.split(k_in, 6)

    node_feats = jax.random.normal(ks[0], (N, 32), jnp.float32)
    node_attrs = jax.nn.one_hot(jax.random.randint(ks[1], (N,), 0, 4), 4,
                                dtype=jnp.float32)
    edge_feats = jax.random.normal(ks[2], (E, 8), jnp.float32)
    vec = jax.random.normal(ks[3], (E, 3), jnp.float32)
    vec = vec / jnp.linalg.norm(vec, axis=1, keepdims=True)
    # spherical harmonics l<=1 with 'component' normalization: [1, sqrt(3)*r_hat]
    edge_attrs = jnp.concatenate(
        [jnp.ones((E, 1), jnp.float32), jnp.sqrt(3.0) * vec], axis=1)
    senders = jax.random.randint(ks[4], (E,), 0, N)
    receivers = jax.random.randint(ks[5], (E,), 0, N)

    data = {
        "node_feats": node_feats,
        "node_attrs": node_attrs,
        "edge_feats": edge_feats,
        "edge_attrs": edge_attrs,
        "edge_index": jnp.stack([senders, receivers]),
    }
    params = init_params(k_par)

    out = convnet_layer_forward(params, data, avg_num_neighbours=3.0,
                                self_connection=True, resnet=False)
    nf = jax.block_until_ready(out["node_feats"])
    assert nf.shape == (N, 32)
    assert bool(jnp.all(jnp.isfinite(nf)))
    print("KERNEL_OK")
</pallas_src>

<mosaic_0001>
module attributes {stable_mosaic.version = 11 : i64} {
  func.func @_linear_up_kernel(%arg0: i32, %arg1: memref<32x32xf32, #tpu.memory_space<vmem>>, %arg2: memref<32x32xbf16, #tpu.memory_space<vmem>>, %arg3: memref<32x32xf32, #tpu.memory_space<vmem>>) attributes {dimension_semantics = [#tpu.dimension_semantics<parallel>], iteration_bounds = array<i64: 2>, scalar_prefetch = 0 : i64, scratch_operands = 0 : i64, tpu.core_type = #tpu.core_type<tc>, window_params = [{transform_indices = @transform_0, window_bounds = array<i64: 32, 32>}, {pipeline_mode = #tpu.pipeline_mode<synchronous>, transform_indices = @transform_1, window_bounds = array<i64: 32, 32>}, {transform_indices = @transform_2, window_bounds = array<i64: 32, 32>}]} {
    %c0 = arith.constant 0 : index
    %c0_0 = arith.constant 0 : index
    %0 = vector.load %arg1[%c0, %c0_0] : memref<32x32xf32, #tpu.memory_space<vmem>>, vector<32x32xf32>
    %1 = arith.truncf %0 : vector<32x32xf32> to vector<32x32xbf16>
    %c0_1 = arith.constant 0 : index
    %c0_2 = arith.constant 0 : index
    %2 = vector.load %arg2[%c0_1, %c0_2] : memref<32x32xbf16, #tpu.memory_space<vmem>>, vector<32x32xbf16>
    %cst = arith.constant dense<0.000000e+00> : vector<32x32xf32>
    %3 = tpu.matmul %1, %2, %cst {dimension_numbers = #tpu.dot_dimension_numbers<[1], [0], [0], [1], [0, 0, 1, 1], [], []>} : vector<32x32xbf16>, vector<32x32xbf16>, vector<32x32xf32> -> vector<32x32xf32>
    %c0_3 = arith.constant 0 : index
    %c0_4 = arith.constant 0 : index
    %4 = vector.load %arg3[%c0_3, %c0_4] : memref<32x32xf32, #tpu.memory_space<vmem>>, vector<32x32xf32>
    tpu.vector_store %arg3[%c0_3, %c0_4], %3 {strides = array<i32>} : memref<32x32xf32, #tpu.memory_space<vmem>>, vector<32x32xf32>,
    return
  }
  func.func @transform_0(%arg0: i32) -> (i32, i32) {
    %c0_i32 = arith.constant 0 : i32
    %c0_i32_0 = arith.constant 0 : i32
    return %arg0, %c0_i32 : i32, i32
  }
  func.func @transform_1(%arg0: i32) -> (i32, i32) {
    %c0_i32 = arith.constant 0 : i32
    %c0_i32_0 = arith.constant 0 : i32
    %c0_i32_1 = arith.constant 0 : i32
    return %c0_i32, %c0_i32_0 : i32, i32
  }
  func.func @transform_2(%arg0: i32) -> (i32, i32) {
    %c0_i32 = arith.constant 0 : i32
    %c0_i32_0 = arith.constant 0 : i32
    return %arg0, %c0_i32 : i32, i32
  }
}

</mosaic_0001>

<bundles_post_ra>
// kernel: tpu_custom_call.1
= control target key start
LH: loop header
LB: loop body
LE: loop exit
PB: predicated region body
PF: predicated region fallthrough
CT: control target
= control target key end

     0   :  { %s346_s9 = smov 0   ;;  %s369_s0 = inlined_call_operand.vmem [shape: f32[64,32], index: 0, kind: input, shape index: {}]   ;;  %s370_s1 = inlined_call_operand.vmem [shape: bf16[32,32], index: 1, kind: input, shape index: {}]   ;;  %s371_s2 = inlined_call_operand.vmem [shape: f32[64,32], index: 2, kind: output, shape index: {}]  }
   0x1 LB: > { %s286_s10 = sadd.s32 4294967295, %s329_s9   ;;  %p290_p0 = scmp.ge.s32.totalorder %s329_s9, 1  ;;  %s329_s9 = sphi %s346_s9, %s12_s9  }
   0x2   : > { %p113_p1 = scmp.lt.s32.totalorder %s329_s9, 3 }
   0x4   : > { %p114_p2 = pnand %p290_p0, %p113_p1 }
   0x5   : > { %s291_s13 = sshll.u32 (!%p114_p2), %s286_s10, 2 }
   0x6   : > { %117 = sbr.rel (%p114_p2) target bundleno = 220 (0xdc), region = 28  ;;  %p136_p3 = scmp.lt.s32.totalorder (!%p114_p2), %s291_s13, 7 }
   0xb   : > { %v321_v0 = vld [vmem:[%s370_s1 + $0x8] sm:$0xff]   ;;  %v322_v1 = vld [vmem:[%s370_s1] sm:$0xff]   ;;  %s373_s13 = smov (!%p136_p3, %s291_s13), 7  ;;  %vm170_vm0 = vcmask 261120  }
   0xc   : > { %305 = vmatprep.subr.bf16.mxu0 %v321_v0  ;;  %s292_s16 = sshll.u32 %s373_s13, 3 }
   0xd   : > { %306 = vmatpush3.bf16.msra.mxu0 %v321_v0  ;;  %s139_s19 = scalar_lea.vmem %s369_s0, %s292_s16  ;;  %s145_s22 = scalar_lea.vmem %s371_s2, %s292_s16 }
   0xe   : > { %307 = vmatprep.subr.bf16.mxu0 %v322_v1  ;;  %v148_v2 = vld [vmem:[%s139_s19] sm:$0xff]  ;;  %v149_v3 = vld [vmem:[%s139_s19 + $0x8] sm:$0xff]  ;;  %v150_v4 = vld [vmem:[%s139_s19 + $0x10] sm:$0xff] }
   0xf   : > { %v152_v5 = vpack.c.bf16 %v149_v3, %v148_v2  ;;  %v151_v6 = vld [vmem:[%s139_s19 + $0x18] sm:$0xff] }
  0x10   : > { %v153_v7 = vpack.c.bf16 %v151_v6, %v150_v4 }
  0x11   : > { %308 = vmatpush3.bf16.msra.mxu0 %v322_v1  ;;  %309 = vmatprep.mubr.msk.bf16.mxu0 %vm170_vm0, %v152_v5 }
  0x14   : > { %310 = vmatmul.mubr.msk.bf16.vlgmr.msra.gmra.mxu0 %vm170_vm0, %v153_v7 }
  0xd4   : > { %v311_v8 = vpop.f32.mrf.mxu0 }
  0xd5   : > { %228 = vst.msk [vmem:[%s145_s22 + $0x10] sm:$0xff] %vm170_vm0, %v311_v8 }
  0xd6   : > { %v211_v9 = vpop.f32.mrf.mxu0 }
  0xd7   : > { %226 = vst.msk [vmem:[%s145_s22] sm:$0xff] %vm170_vm0, %v211_v9 }
  0xd8   : > { %v312_v10 = vpop.f32.mrf.mxu0 }
  0xd9   : > { %229 = vst.msk [vmem:[%s145_s22 + $0x18] sm:$0xff] %vm170_vm0, %v312_v10 }
  0xda   : > { %v214_v11 = vpop.f32.mrf.mxu0 }
  0xdb   : > { %227 = vst.msk [vmem:[%s145_s22 + $0x8] sm:$0xff] %vm170_vm0, %v214_v11 }
  0xdc PF: > { %s12_s9 = sadd.s32 1, %s329_s9  }
  0xdd   : > { %p9_p4 = scmp.ge.s32.totalorder %s12_s9, 4  }
  0xdf   :  { %11 = sbr.rel (!%p9_p4) target bundleno = 1 (0x1), region = 58 }

</bundles_post_ra>
